<compile_context>
chip_gen: v6e
topology: v6e:2x2x1
jax: 0.10.0
libtpu: 0.0.40
codegen_flags: <defaults>
</compile_context>

<pallas_src>
import functools

import jax
import jax.numpy as jnp
from jax.experimental import pallas as pl
from jax.experimental.pallas import tpu as pltpu


def _round_up(x, m):
    return ((x + m - 1) // m) * m


def _vmem_capacity_bytes():
    """Physical VMEM per TensorCore; conservative 64 MiB fallback (v7x-safe)."""
    try:
        return int(pltpu.get_tpu_info().vmem_capacity_bytes)
    except Exception:
        return 64 << 20


def _choose_tiles(m_hint, Hp, Ip_guess, cb, vmem_budget):
    """Pick (tm, ti) so the double-buffered tile footprint fits the VMEM budget."""
    sub = max(8, 32 // cb)                       # sublane packing multiple
    tm = max(sub, min(512, _round_up(m_hint, sub)))
    ti = max(128, (min(512, Ip_guess) // 128) * 128)

    def footprint(tm_, ti_):
        return (2 * tm_ * Hp * cb                # x tiles (double buffered)
                + 2 * Hp * (2 * ti_) * cb        # fused [gate|up] weight tiles
                + 2 * ti_ * Hp * cb              # down-proj weight tiles
                + 2 * tm_ * Hp * 4               # output tiles (f32 worst case)
                + tm_ * Hp * 4                   # f32 accumulator scratch
                + (2 * Ip_guess + Hp) * 4        # biases (resident once)
                + (1 << 16))                     # slack

    while footprint(tm, ti) > vmem_budget:
        if ti > 256:                              # keep ti a 256-multiple (MXU width)
            ti -= 256
        elif tm > 2 * sub:
            tm = _round_up(tm // 2, sub)
        elif ti > 128:
            ti = 128
        else:
            break
    return tm, ti


def mlp_kernel(x_ref, wgu_ref, bgu_ref, wd_ref, bd_ref, o_ref, acc_ref, *, ti):
    """Grid = (M tiles, I tiles).  Axis 1 is the reduction over the intermediate dim."""
    k = pl.program_id(1)
    nk = pl.num_programs(1)

    x = x_ref[...]                                                    # (tm, Hp), compute dtype
    # Single fused MXU pass for gate & up: weight block is [gate_k | up_k].
    gu = jnp.dot(x, wgu_ref[...], preferred_element_type=jnp.float32)  # (tm, 2*ti) f32
    gu = gu + bgu_ref[pl.ds(k, 1), :]                                  # per-tile biases (f32)

    g = gu[:, :ti]
    u = gu[:, ti:]
    h = (g * jax.nn.sigmoid(g)) * u                                    # SiLU(gate)*up, f32

    partial = jnp.dot(h.astype(x_ref.dtype), wd_ref[...],
                      preferred_element_type=jnp.float32)              # (tm, Hp) f32

    @pl.when(k == 0)
    def _():                                   # no zero-fill pass: store first partial
        acc_ref[...] = partial

    @pl.when(k > 0)
    def _():
        acc_ref[...] += partial

    @pl.when(k == nk - 1)
    def _():                                   # down-proj bias added exactly once
        o_ref[...] = (acc_ref[...] + bd_ref[...]).astype(o_ref.dtype)


def prepare_mlp_params(w_gate, b_gate, w_up, b_up, w_down, b_down, *,
                       m_hint=512, compute_dtype=jnp.bfloat16):
    """One-time parameter preprocessing (padding, dtype cast, gate/up fusion).

    Weights are given pre-transposed as [in_features, out_features].
    """
    H, I = w_gate.shape
    assert w_up.shape == (H, I) and w_down.shape == (I, H)
    b_gate = jnp.reshape(b_gate, (1, I)).astype(jnp.float32)
    b_up = jnp.reshape(b_up, (1, I)).astype(jnp.float32)
    b_down = jnp.reshape(b_down, (1, H)).astype(jnp.float32)

    cb = jnp.dtype(compute_dtype).itemsize
    Hp = _round_up(H, 128)
    Ip_guess = _round_up(I, 128)

    budget = int(0.85 * _vmem_capacity_bytes())
    tm, ti = _choose_tiles(m_hint, Hp, Ip_guess, cb, budget)
    ti = min(ti, Ip_guess)
    Ip = _round_up(I, ti)
    nk = Ip // ti

    # Zero padding keeps semantics exact: padded I columns have zero weights and
    # zero biases -> g = u = 0 -> h = 0; padded H columns are sliced off.
    wg = jnp.pad(w_gate.astype(compute_dtype), ((0, Hp - H), (0, Ip - I)))
    wu = jnp.pad(w_up.astype(compute_dtype), ((0, Hp - H), (0, Ip - I)))
    # Interleave per I-tile so block k of the fused weight is [gate_k | up_k].
    wgu = jnp.concatenate(
        [wg.reshape(Hp, nk, ti), wu.reshape(Hp, nk, ti)], axis=2
    ).reshape(Hp, 2 * Ip)

    bg = jnp.pad(b_gate, ((0, 0), (0, Ip - I))).reshape(nk, ti)
    bu = jnp.pad(b_up, ((0, 0), (0, Ip - I))).reshape(nk, ti)
    bgu = jnp.concatenate([bg, bu], axis=1)                            # (nk, 2*ti) f32

    wd = jnp.pad(w_down.astype(compute_dtype), ((0, Ip - I), (0, Hp - H)))
    bd = jnp.pad(b_down, ((0, 0), (0, Hp - H)))                        # (1, Hp) f32

    return dict(wgu=wgu, bgu=bgu, wd=wd, bd=bd,
                H=H, I=I, Hp=Hp, Ip=Ip, ti=ti, tm=tm, nk=nk,
                compute_dtype=compute_dtype, vmem_budget=budget)


def mlp_pallas(x2d, prep):
    """x2d: [M, H] (any float dtype) -> [M, H] in x2d.dtype."""
    M, H = x2d.shape
    assert H == prep["H"]
    Hp, Ip, ti, nk = prep["Hp"], prep["Ip"], prep["ti"], prep["nk"]
    cdt = prep["compute_dtype"]
    out_dtype = x2d.dtype
    cb = jnp.dtype(cdt).itemsize
    ob = jnp.dtype(out_dtype).itemsize
    sub = max(8, 32 // cb)

    tm = min(prep["tm"], _round_up(M, sub))
    Mp = _round_up(M, tm)

    xp = x2d.astype(cdt)
    if (Mp, Hp) != (M, H):
        xp = jnp.pad(xp, ((0, Mp - M), (0, Hp - H)))

    grid = (Mp // tm, nk)
    n_m_tiles = Mp // tm

    # Actual per-tile footprint; limit capped at ~85% of physical VMEM.
    vmem_bytes = (2 * tm * Hp * cb + 2 * Hp * 2 * ti * cb + 2 * ti * Hp * cb
                  + 2 * tm * Hp * ob + tm * Hp * 4 + (2 * Ip + Hp) * 4 + (1 << 16))
    vmem_limit = int(min(max(2 * vmem_bytes, 32 << 20), prep["vmem_budget"]))

    cost = pl.CostEstimate(
        flops=6 * M * H * prep["I"],                   # gate + up + down matmuls
        transcendentals=M * prep["I"],                 # sigmoid
        bytes_accessed=int(2 * M * H * ob
                           + n_m_tiles * 3 * Hp * Ip * cb   # weights re-streamed per M tile
                           + (2 * Ip + Hp) * 4),
    )

    kernel = functools.partial(mlp_kernel, ti=ti)

    out = pl.pallas_call(
        kernel,
        out_shape=jax.ShapeDtypeStruct((Mp, Hp), out_dtype),
        grid_spec=pltpu.PrefetchScalarGridSpec(
            num_scalar_prefetch=0,
            grid=grid,
            in_specs=[
                pl.BlockSpec((tm, Hp), lambda i, k: (i, 0)),       # x tile (re-used over k)
                pl.BlockSpec((Hp, 2 * ti), lambda i, k: (0, k)),   # fused [gate_k | up_k] weights
                pl.BlockSpec((nk, 2 * ti), lambda i, k: (0, 0)),   # all gate/up biases (one DMA)
                pl.BlockSpec((ti, Hp), lambda i, k: (k, 0)),       # down weight tile
                pl.BlockSpec((1, Hp), lambda i, k: (0, 0)),        # down bias (one DMA)
            ],
            out_specs=pl.BlockSpec((tm, Hp), lambda i, k: (i, 0)),
            scratch_shapes=[pltpu.VMEM((tm, Hp), jnp.float32)],
        ),
        compiler_params=pltpu.CompilerParams(
            dimension_semantics=("parallel", "arbitrary"),
            vmem_limit_bytes=vmem_limit,
        ),
        cost_estimate=cost,
    )(xp, prep["wgu"], prep["bgu"], prep["wd"], prep["bd"])

    if (Mp, Hp) != (M, H):
        out = out[:M, :H]
    return out


def mlp_forward(x_bsh, prep):
    """x_bsh: [batch, seq, hidden] -> [batch, seq, hidden]."""
    B, S, H = x_bsh.shape
    out2d = mlp_pallas(x_bsh.reshape(B * S, H), prep)
    return out2d.reshape(B, S, H)


def mlp_reference(x_bsh, params):
    x = x_bsh.astype(jnp.float32)
    g = x @ params["w_gate"] + params["b_gate"]
    u = x @ params["w_up"] + params["b_up"]
    h = jax.nn.silu(g) * u
    o = h @ params["w_down"] + params["b_down"]
    return o.astype(x_bsh.dtype)


if __name__ == "__main__":
    # Small config consistent with the module: hidden_size=32, intermediate_size=64.
    batch, seq, hidden, inter = 2, 8, 32, 64

    key = jax.random.PRNGKey(0)
    kx, kg, kbg, ku, kbu, kd, kbd = jax.random.split(key, 7)

    x = jax.random.normal(kx, (batch, seq, hidden), dtype=jnp.float32)

    scale_h = 1.0 / jnp.sqrt(hidden)
    scale_i = 1.0 / jnp.sqrt(inter)
    params = {
        "w_gate": jax.random.normal(kg, (hidden, inter), dtype=jnp.float32) * scale_h,
        "b_gate": jax.random.normal(kbg, (1, inter), dtype=jnp.float32) * 0.01,
        "w_up":   jax.random.normal(ku, (hidden, inter), dtype=jnp.float32) * scale_h,
        "b_up":   jax.random.normal(kbu, (1, inter), dtype=jnp.float32) * 0.01,
        "w_down": jax.random.normal(kd, (inter, hidden), dtype=jnp.float32) * scale_i,
        "b_down": jax.random.normal(kbd, (1, hidden), dtype=jnp.float32) * 0.01,
    }

    # One-time parameter preprocessing (padding / dtype cast / gate-up fusion)
    # hoisted out of the forward path.
    prep = prepare_mlp_params(
        params["w_gate"], params["b_gate"],
        params["w_up"], params["b_up"],
        params["w_down"], params["b_down"],
        m_hint=batch * seq, compute_dtype=jnp.bfloat16,
    )

    out = mlp_forward(x, prep)
    out = jax.block_until_ready(out)

    ref = mlp_reference(x, params)
    assert out.shape == (batch, seq, hidden)
    # bf16 MXU inputs (perf feedback) -> compare against the f32 reference with
    # a bf16-appropriate tolerance.
    assert jnp.allclose(out, ref, atol=1e-1, rtol=1e-1), "mismatch vs reference"

    print("KERNEL_OK")
</pallas_src>

<mosaic_0001>
module attributes {stable_mosaic.version = 11 : i64} {
  func.func @mlp_kernel(%arg0: i32, %arg1: i32, %arg2: memref<16x128xbf16, #tpu.memory_space<vmem>>, %arg3: memref<128x256xbf16, #tpu.memory_space<vmem>>, %arg4: memref<1x256xf32, #tpu.memory_space<vmem>>, %arg5: memref<128x128xbf16, #tpu.memory_space<vmem>>, %arg6: memref<1x128xf32, #tpu.memory_space<vmem>>, %arg7: memref<16x128xf32, #tpu.memory_space<vmem>>, %arg8: memref<16x128xf32, #tpu.memory_space<vmem>>) attributes {dimension_semantics = [#tpu.dimension_semantics<parallel>, #tpu.dimension_semantics<arbitrary>], iteration_bounds = array<i64: 1, 1>, scalar_prefetch = 0 : i64, scratch_operands = 1 : i64, tpu.core_type = #tpu.core_type<tc>, window_params = [{transform_indices = @transform_0, window_bounds = array<i64: 16, 128>}, {transform_indices = @transform_1, window_bounds = array<i64: 128, 256>}, {pipeline_mode = #tpu.pipeline_mode<synchronous>, transform_indices = @transform_2, window_bounds = array<i64: 1, 256>}, {transform_indices = @transform_3, window_bounds = array<i64: 128, 128>}, {pipeline_mode = #tpu.pipeline_mode<synchronous>, transform_indices = @transform_4, window_bounds = array<i64: 1, 128>}, {transform_indices = @transform_5, window_bounds = array<i64: 16, 128>}]} {
    %c0 = arith.constant 0 : index
    %c0_0 = arith.constant 0 : index
    %0 = vector.load %arg2[%c0, %c0_0] : memref<16x128xbf16, #tpu.memory_space<vmem>>, vector<16x128xbf16>
    %c0_1 = arith.constant 0 : index
    %c0_2 = arith.constant 0 : index
    %1 = vector.load %arg3[%c0_1, %c0_2] : memref<128x256xbf16, #tpu.memory_space<vmem>>, vector<128x256xbf16>
    %cst = arith.constant dense<0.000000e+00> : vector<16x256xf32>
    %2 = tpu.matmul %0, %1, %cst {dimension_numbers = #tpu.dot_dimension_numbers<[1], [0], [0], [1], [0, 0, 1, 1], [], []>} : vector<16x128xbf16>, vector<128x256xbf16>, vector<16x256xf32> -> vector<16x256xf32>
    %3 = arith.index_cast %arg1 : i32 to index
    %c0_3 = arith.constant 0 : index
    %4 = vector.load %arg4[%3, %c0_3] : memref<1x256xf32, #tpu.memory_space<vmem>>, vector<1x256xf32>
    %5 = vector.broadcast %4 : vector<1x256xf32> to vector<16x256xf32>
    %6 = arith.addf %2, %5 : vector<16x256xf32>
    %7 = vector.extract_strided_slice %6 {offsets = [0, 0], sizes = [16, 128], strides = [1, 1]} : vector<16x256xf32> to vector<16x128xf32>
    %8 = vector.extract_strided_slice %6 {offsets = [0, 128], sizes = [16, 128], strides = [1, 1]} : vector<16x256xf32> to vector<16x128xf32>
    %9 = arith.negf %7 : vector<16x128xf32>
    %10 = math.exp %9 : vector<16x128xf32>
    %cst_4 = arith.constant 1.000000e+00 : f32
    %11 = vector.broadcast %cst_4 : f32 to vector<16x128xf32>
    %12 = arith.addf %11, %10 : vector<16x128xf32>
    %13 = arith.divf %11, %12 : vector<16x128xf32>
    %14 = arith.mulf %7, %13 : vector<16x128xf32>
    %15 = arith.mulf %14, %8 : vector<16x128xf32>
    %16 = arith.truncf %15 : vector<16x128xf32> to vector<16x128xbf16>
    %c0_5 = arith.constant 0 : index
    %c0_6 = arith.constant 0 : index
    %17 = vector.load %arg5[%c0_5, %c0_6] : memref<128x128xbf16, #tpu.memory_space<vmem>>, vector<128x128xbf16>
    %cst_7 = arith.constant dense<0.000000e+00> : vector<16x128xf32>
    %18 = tpu.matmul %16, %17, %cst_7 {dimension_numbers = #tpu.dot_dimension_numbers<[1], [0], [0], [1], [0, 0, 1, 1], [], []>} : vector<16x128xbf16>, vector<128x128xbf16>, vector<16x128xf32> -> vector<16x128xf32>
    %c0_i32 = arith.constant 0 : i32
    %19 = arith.cmpi eq, %arg1, %c0_i32 : i32
    %20 = arith.extui %19 : i1 to i32
    %c0_i32_8 = arith.constant 0 : i32
    %21 = arith.cmpi ne, %20, %c0_i32_8 : i32
    scf.if %21 {
      %c0_13 = arith.constant 0 : index
      %c0_14 = arith.constant 0 : index
      %28 = vector.load %arg8[%c0_13, %c0_14] : memref<16x128xf32, #tpu.memory_space<vmem>>, vector<16x128xf32>
      tpu.vector_store %arg8[%c0_13, %c0_14], %18 {strides = array<i32>} : memref<16x128xf32, #tpu.memory_space<vmem>>, vector<16x128xf32>,
    } else {
    }
    %c0_i32_9 = arith.constant 0 : i32
    %22 = arith.cmpi sgt, %arg1, %c0_i32_9 : i32
    %23 = arith.extui %22 : i1 to i32
    %c0_i32_10 = arith.constant 0 : i32
    %24 = arith.cmpi ne, %23, %c0_i32_10 : i32
    scf.if %24 {
      %c0_13 = arith.constant 0 : index
      %c0_14 = arith.constant 0 : index
      %28 = vector.load %arg8[%c0_13, %c0_14] : memref<16x128xf32, #tpu.memory_space<vmem>>, vector<16x128xf32>
      %29 = arith.addf %28, %18 : vector<16x128xf32>
      %c0_15 = arith.constant 0 : index
      %c0_16 = arith.constant 0 : index
      %30 = vector.load %arg8[%c0_15, %c0_16] : memref<16x128xf32, #tpu.memory_space<vmem>>, vector<16x128xf32>
      tpu.vector_store %arg8[%c0_15, %c0_16], %29 {strides = array<i32>} : memref<16x128xf32, #tpu.memory_space<vmem>>, vector<16x128xf32>,
    } else {
    }
    %c0_i32_11 = arith.constant 0 : i32
    %25 = arith.cmpi eq, %arg1, %c0_i32_11 : i32
    %26 = arith.extui %25 : i1 to i32
    %c0_i32_12 = arith.constant 0 : i32
    %27 = arith.cmpi ne, %26, %c0_i32_12 : i32
    scf.if %27 {
      %c0_13 = arith.constant 0 : index
      %c0_14 = arith.constant 0 : index
      %28 = vector.load %arg8[%c0_13, %c0_14] : memref<16x128xf32, #tpu.memory_space<vmem>>, vector<16x128xf32>
      %c0_15 = arith.constant 0 : index
      %c0_16 = arith.constant 0 : index
      %29 = vector.load %arg6[%c0_15, %c0_16] : memref<1x128xf32, #tpu.memory_space<vmem>>, vector<1x128xf32>
      %30 = vector.broadcast %29 : vector<1x128xf32> to vector<16x128xf32>
      %31 = arith.addf %28, %30 : vector<16x128xf32>
      %c0_17 = arith.constant 0 : index
      %c0_18 = arith.constant 0 : index
      %32 = vector.load %arg7[%c0_17, %c0_18] : memref<16x128xf32, #tpu.memory_space<vmem>>, vector<16x128xf32>
      tpu.vector_store %arg7[%c0_17, %c0_18], %31 {strides = array<i32>} : memref<16x128xf32, #tpu.memory_space<vmem>>, vector<16x128xf32>,
    } else {
    }
    return
  }
  func.func @transform_0(%arg0: i32, %arg1: i32) -> (i32, i32) {
    %c0_i32 = arith.constant 0 : i32
    %c0_i32_0 = arith.constant 0 : i32
    return %arg0, %c0_i32 : i32, i32
  }
  func.func @transform_1(%arg0: i32, %arg1: i32) -> (i32, i32) {
    %c0_i32 = arith.constant 0 : i32
    %c0_i32_0 = arith.constant 0 : i32
    return %c0_i32, %arg1 : i32, i32
  }
  func.func @transform_2(%arg0: i32, %arg1: i32) -> (i32, i32) {
    %c0_i32 = arith.constant 0 : i32
    %c0_i32_0 = arith.constant 0 : i32
    %c0_i32_1 = arith.constant 0 : i32
    return %c0_i32, %c0_i32_0 : i32, i32
  }
  func.func @transform_3(%arg0: i32, %arg1: i32) -> (i32, i32) {
    %c0_i32 = arith.constant 0 : i32
    %c0_i32_0 = arith.constant 0 : i32
    return %arg1, %c0_i32 : i32, i32
  }
  func.func @transform_4(%arg0: i32, %arg1: i32) -> (i32, i32) {
    %c0_i32 = arith.constant 0 : i32
    %c0_i32_0 = arith.constant 0 : i32
    %c0_i32_1 = arith.constant 0 : i32
    return %c0_i32, %c0_i32_0 : i32, i32
  }
  func.func @transform_5(%arg0: i32, %arg1: i32) -> (i32, i32) {
    %c0_i32 = arith.constant 0 : i32
    %c0_i32_0 = arith.constant 0 : i32
    return %arg0, %c0_i32 : i32, i32
  }
}

</mosaic_0001>

<bundles_post_ra>
// kernel: tpu_custom_call.1
= control target key start
LH: loop header
LB: loop body
LE: loop exit
PB: predicated region body
PF: predicated region fallthrough
CT: control target
= control target key end

     0   :  { %10 = vsyncpa [#allocation4], 0  ;;  %s656_s0 = inlined_call_operand.hbm [shape: bf16[16,128], index: 0, kind: input, shape index: {}]   ;;  %s657_s1 = inlined_call_operand.hbm [shape: bf16[128,256], index: 1, kind: input, shape index: {}]   ;;  %s658_s2 = inlined_call_operand.vmem [shape: f32[1,256], index: 2, kind: input, shape index: {}]   ;;  %s659_s3 = inlined_call_operand.hbm [shape: bf16[128,128], index: 3, kind: input, shape index: {}]   ;;  %s660_s4 = inlined_call_operand.vmem [shape: f32[1,128], index: 4, kind: input, shape index: {}]   ;;  %s661_s5 = inlined_call_operand.hbm [shape: f32[16,128], index: 5, kind: output, shape index: {}]  }
   0x1   :  { %11 = vsyncpa [#allocation7], 0 }
   0x2   :  { %12 = vsyncpa [#allocation5], 0  ;;  %s591_s18 = smov [#allocation6]  }
   0x3   :  { %s30_s19 = sshll.u32 %s591_s18, 4  ;;  %s31_s19 = int_to_ptr.vmem [resolvable:$true] %s30_s19 }
   0x4   :  { %s513_s20 = scalar_lea.vmem %s31_s19, 2048  ;;  %p518_p1 = scmp.lt.s32.totalorder %s31_s19, %s31_s19 }
   0x5   :  { %p514_p0 = scmp.ne.s32.totalorder %s31_s19, %s513_s20  ;;  %p519_p2 = scmp.lt.s32.totalorder %s513_s20, %s513_s20 }
   0x7   :  { %p520_p3 = por %p519_p2, %p518_p1 }
   0x9   :  { %p521_p4 = pnand %p520_p3, %p514_p0 }
   0xb   :  { %524 = shalt.err (!%p521_p4)
}
   0xc   :  { %s592_s21 = smov 128   ;;  %s593_s22 = smov 8  }
   0xd   :  { %36 = dma.hbm_to_vmem [thread:$0]  %s657_s1, 2048, %s31_s19, [#allocation7], %s592_s21, %s592_s21, %s593_s22  }
   0xe   :  { %s594_s25 = smov [#allocation3]  }
   0xf   :  { %s18_s26 = sshll.u32 %s594_s25, 4  ;;  %s19_s26 = int_to_ptr.vmem [resolvable:$true] %s18_s26 }
  0x10   :  { %s533_s27 = scalar_lea.vmem %s19_s26, 128  ;;  %p538_p6 = scmp.lt.s32.totalorder %s19_s26, %s19_s26 }
  0x11   :  { %p534_p5 = scmp.ne.s32.totalorder %s19_s26, %s533_s27  ;;  %p539_p7 = scmp.lt.s32.totalorder %s533_s27, %s533_s27 }
  0x13   :  { %p540_p8 = por %p539_p7, %p538_p6 }
  0x15   :  { %p541_p9 = pnand %p540_p8, %p534_p5 }
  0x17   :  { %544 = shalt.err (!%p541_p9)
}
  0x18   :  { %s595_s28 = smov 64   ;;  %s596_s29 = smov 4  }
  0x19   :  { %24 = dma.hbm_to_vmem [thread:$0]  %s656_s0, 128, %s19_s26, [#allocation4], %s595_s28, %s595_s28, %s596_s29  }
  0x1a   :  { %s597_s7 = smov [#allocation8]  }
  0x1b   :  { %s44_s8 = sshll.u32 %s597_s7, 4  ;;  %s45_s8 = int_to_ptr.vmem [resolvable:$true] %s44_s8 }
  0x1c   :  { %s553_s1 = scalar_lea.vmem %s45_s8, 1024  ;;  %p558_p11 = scmp.lt.s32.totalorder %s45_s8, %s45_s8 }
  0x1d   :  { %p554_p10 = scmp.ne.s32.totalorder %s45_s8, %s553_s1  ;;  %p559_p12 = scmp.lt.s32.totalorder %s553_s1, %s553_s1 }
  0x1f   :  { %p560_p13 = por %p559_p12, %p558_p11 }
  0x21   :  { %p561_p0 = pnand %p560_p13, %p554_p10 }
  0x23   :  { %564 = shalt.err (!%p561_p0)
}
  0x24   :  { %50 = dma.hbm_to_vmem [thread:$0]  %s659_s3, 1024, %s45_s8, [#allocation7], %s595_s28, %s595_s28, %s596_s29  }
  0x25   :  { %585 = dma.done.wait [#allocation4], 128  }
  0x26   :  { %586 = vsyncadd [#allocation4], 4294967168 }
  0x27   :  { %587 = dma.done.wait [#allocation7], 3072  }
  0x28   :  { %588 = vsyncadd [#allocation7], 4294964224  ;;  %v598_v0 = vmov 0   ;;  %v464_v1 = vld [vmem:[#allocation6 + $0x74] ss:$8 sps:$4 sm:$0xff]   ;;  %v599_v19 = vmov 0.0   ;;  %v85_v27 = vlaneseq }
  0x29   :  { %213 = vmatprep.mubr.bf16.mxu0 %v598_v0  ;;  %v466_v2 = vld [vmem:[#allocation6 + $0x70] ss:$8 sps:$4 sm:$0xff]   ;;  %181 = vmatprep.subr.bf16.mxu0 %v464_v1  ;;  %v467_v3 = vld [vmem:[#allocation6 + $0x64] ss:$8 sps:$4 sm:$0xff]   ;;  %v469_v4 = vld [vmem:[#allocation6 + $0x60] ss:$8 sps:$4 sm:$0xff]  }
  0x2a   :  { %182 = vmatpush1.bf16.msra.mxu0 %v466_v2  ;;  %v470_v5 = vld [vmem:[#allocation6 + $0x54] ss:$8 sps:$4 sm:$0xff]   ;;  %v472_v6 = vld [vmem:[#allocation6 + $0x50] ss:$8 sps:$4 sm:$0xff]   ;;  %v473_v7 = vld [vmem:[#allocation6 + $0x44] ss:$8 sps:$4 sm:$0xff]   ;;  %433 = vmatprep.subr.bf16.mxu1 %v599_v19 }
  0x2b   :  { %183 = vmatprep.subr.bf16.mxu0 %v467_v3  ;;  %v475_v8 = vld [vmem:[#allocation6 + $0x40] ss:$8 sps:$4 sm:$0xff]   ;;  %v476_v9 = vld [vmem:[#allocation6 + $0x34] ss:$8 sps:$4 sm:$0xff]   ;;  %v478_v10 = vld [vmem:[#allocation6 + $0x30] ss:$8 sps:$4 sm:$0xff]  }
  0x2c   :  { %v479_v11 = vld [vmem:[#allocation6 + $0x24] ss:$8 sps:$4 sm:$0xff]   ;;  %v481_v12 = vld [vmem:[#allocation6 + $0x20] ss:$8 sps:$4 sm:$0xff]   ;;  %v482_v13 = vld [vmem:[#allocation6 + $0x14] ss:$8 sps:$4 sm:$0xff]  }
  0x2d   :  { %v484_v14 = vld [vmem:[#allocation6 + $0x10] ss:$8 sps:$4 sm:$0xff]   ;;  %v485_v15 = vld [vmem:[#allocation6 + $0x4] ss:$8 sps:$4 sm:$0xff]   ;;  %v487_v16 = vld [vmem:[#allocation6] ss:$8 sps:$4 sm:$0xff]  }
  0x2e   :  { %184 = vmatpush1.bf16.msra.mxu0 %v469_v4  ;;  %v488_v17 = vld [vmem:[#allocation3] sm:$0xff]   ;;  %v490_v20 = vld [vmem:[#allocation8 + $0x30] sm:$0xff]   ;;  %v491_v21 = vld [vmem:[#allocation8 + $0x28] sm:$0xff]   ;;  %vm600_vm0 = vmmov 0   ;;  %v86_v28 = vshrl.u32 %v85_v27, 7  ;;  %s601_s12 = smov [#allocation9]  }
  0x2f   :  { %185 = vmatprep.subr.bf16.mxu0 %v470_v5  ;;  %v489_v18 = vld [vmem:[#allocation8 + $0x38] sm:$0xff]   ;;  %v492_v22 = vld [vmem:[#allocation8 + $0x20] sm:$0xff]   ;;  %v494_v24 = vld [vmem:[#allocation8 + $0x10] sm:$0xff]   ;;  %449 = vmatprep.mubr.msk.bf16.mxu1 %vm600_vm0, %v599_v19  ;;  %s383_s13 = sshll.u32 %s601_s12, 4  ;;  %s384_s13 = int_to_ptr.vmem [resolvable:$true] %s383_s13 }
  0x30   :  { %434 = vmatpush3.bf16.msra.mxu1 %v489_v18  ;;  %v493_v23 = vld [vmem:[#allocation8 + $0x18] sm:$0xff]   ;;  %v495_v25 = vld [vmem:[#allocation8 + $0x8] sm:$0xff]   ;;  %v496_v26 = vld [vmem:[#allocation8] sm:$0xff]   ;;  %v87_v29 = vsub.s32 0, %v86_v28  ;;  %v91_v43 = vsub.s32 1, %v86_v28  ;;  %s565_s14 = scalar_lea.vmem %s384_s13, 256  ;;  %p570_p2 = scmp.lt.s32.totalorder %s384_s13, %s384_s13 }
  0x31   :  { %435 = vmatprep.subr.bf16.mxu1 %v599_v19  ;;  %v83_v30 = vld [vmem:[%s658_s2] sm:$0x3]  ;;  %p566_p1 = scmp.ne.s32.totalorder %s384_s13, %s565_s14  ;;  %p571_p3 = scmp.lt.s32.totalorder %s565_s14, %s565_s14 }
  0x32   :  { %186 = vmatpush1.bf16.msra.mxu0 %v472_v6  ;;  %v88_v31 = vrot.slane %v83_v30, %v87_v29  ;;  %v92_v45 = vrot.slane %v83_v30, %v91_v43  ;;  %v423_v55 = vld [vmem:[%s660_s4] ss:$0 sm:$0xff] }
  0x33   :  { %187 = vmatprep.subr.bf16.mxu0 %v473_v7  ;;  %p572_p4 = por %p571_p3, %p570_p2 }
  0x34   :  { %436 = vmatpush3.bf16.msra.mxu1 %v490_v20 }
  0x35   :  { %437 = vmatprep.subr.bf16.mxu1 %v599_v19  ;;  %p573_p5 = pnand %p572_p4, %p566_p1 }
  0x36   :  { %188 = vmatpush1.bf16.msra.mxu0 %v475_v8 }
  0x37   :  { %189 = vmatprep.subr.bf16.mxu0 %v476_v9 }
  0x38   :  { %438 = vmatpush3.bf16.msra.mxu1 %v491_v21 }
  0x39   :  { %439 = vmatprep.subr.bf16.mxu1 %v599_v19 }
  0x3a   :  { %190 = vmatpush1.bf16.msra.mxu0 %v478_v10 }
  0x3b   :  { %191 = vmatprep.subr.bf16.mxu0 %v479_v11 }
  0x3c   :  { %440 = vmatpush3.bf16.msra.mxu1 %v492_v22 }
  0x3d   :  { %441 = vmatprep.subr.bf16.mxu1 %v599_v19 }
  0x3e   :  { %192 = vmatpush1.bf16.msra.mxu0 %v481_v12 }
  0x3f   :  { %193 = vmatprep.subr.bf16.mxu0 %v482_v13 }
  0x40   :  { %442 = vmatpush3.bf16.msra.mxu1 %v493_v23 }
  0x41   :  { %443 = vmatprep.subr.bf16.mxu1 %v599_v19 }
  0x42   :  { %194 = vmatpush1.bf16.msra.mxu0 %v484_v14 }
  0x43   :  { %195 = vmatprep.subr.bf16.mxu0 %v485_v15 }
  0x44   :  { %444 = vmatpush3.bf16.msra.mxu1 %v494_v24 }
  0x45   :  { %445 = vmatprep.subr.bf16.mxu1 %v599_v19 }
  0x46   :  { %196 = vmatpush1.bf16.msra.mxu0 %v487_v16 }
  0x48   :  { %446 = vmatpush3.bf16.msra.mxu1 %v495_v25 }
  0x49   :  { %214 = vmatmul.mubr.bf16.vlgmr.msra.gmra.mxu0 %v488_v17  ;;  %447 = vmatprep.subr.bf16.mxu1 %v599_v19 }
  0x4c   :  { %448 = vmatpush3.bf16.msra.mxu1 %v496_v26 }
 0x109   :  { %v215_v32 = vpop.f32.mrf.mxu0 }
 0x10a   :  { %v216_v33 = vadd.f32 %v215_v32, %v88_v31 }
 0x10b   :  { %v217_v34 = vpop.f32.mrf.mxu0 }
 0x10c   :  { %v413_v35 = vmul.f32 -1.442695, %v216_v33  ;;  %v218_v49 = vadd.f32 %v217_v34, %v92_v45 }
 0x10d   :  { %v219_v36 = vpop.f32.mrf.mxu0 }
 0x10e   :  { %497 = vpow2.f32 %v413_v35  ;;  %v220_v37 = vadd.f32 %v219_v36, %v88_v31 }
 0x10f   :  { %v221_v46 = vpop.f32.mrf.mxu0 }
 0x110   :  { %v414_v38 = vmul.f32 -1.442695, %v220_v37  ;;  %v222_v51 = vadd.f32 %v221_v46, %v92_v45 }
 0x112   :  { %499 = vpow2.f32 %v414_v38 }
 0x11b   :  { %v498_v39 = vpop.eup %497 }
 0x11c   :  { %v230_v40 = vadd.f32 1.0, %v498_v39 }
 0x11e   :  { %501 = vrcp.f32 %v230_v40 }
 0x11f   :  { %v500_v41 = vpop.eup %499 }
 0x120   :  { %v231_v42 = vadd.f32 1.0, %v500_v41 }
 0x122   :  { %503 = vrcp.f32 %v231_v42 }
 0x12b   :  { %v502_v44 = vpop.eup %501 }
 0x12c   :  { %v236_v47 = vmul.f32 %v502_v44, %v216_v33 }
 0x12e   :  { %v238_v52 = vmul.f32 %v236_v47, %v218_v49 }
 0x12f   :  { %v504_v48 = vpop.eup %503 }
 0x130   :  { %v237_v50 = vmul.f32 %v504_v48, %v220_v37 }
 0x132   :  { %v239_v53 = vmul.f32 %v237_v50, %v222_v51 }
 0x134   :  { %v240_v54 = vpack.c.bf16 %v239_v53, %v238_v52 }
 0x136   :  { %450 = vmatmul.mubr.bf16.vlgmr.msra.gmra.mxu1 %v240_v54 }
 0x1f6   :  { %v339_v56 = vpop.f32.mrf.mxu1 }
 0x1f7   :  { %v374_v57 = vadd.f32 %v423_v55, %v339_v56 }
 0x1f8   :  { %v451_v58 = vpop.f32.mrf.mxu1 }
 0x1f9   :  { %376 = vst [vmem:[#allocation9] sm:$0xff] %v374_v57 }
 0x1fa   :  { %v342_v59 = vpop.f32.mrf.mxu1 }
 0x1fb   :  { %v375_v60 = vadd.f32 %v423_v55, %v342_v59 }
 0x1fc   :  { %v452_v61 = vpop.f32.mrf.mxu1 }
 0x1fd   :  { %377 = vst [vmem:[#allocation9 + $0x8] sm:$0xff] %v375_v60 }
 0x1fe   :  { %576 = shalt.err (!%p573_p5)
}
 0x1ff   :  { %389 = dma.vmem_to_hbm [thread:$0]  %s384_s13, 256, %s661_s5, [#allocation5], %s592_s21, %s592_s21, %s593_s22  }
 0x200   :  { %589 = dma.done.wait [#allocation5], 256  }
 0x201   :  { %590 = vsyncadd [#allocation5], 4294967040 }
 0x202   :  { %393 = vsyncpa [#allocation4], 1 }
 0x203   :  { %394 = vsyncpa [#allocation7], 1 }
 0x204   :  { %395 = vsyncpa [#allocation5], 1 }

</bundles_post_ra>
